<compile_context>
chip_gen: v7x
topology: tpu7x:2x2x1
jax: 0.10.0
libtpu: 0.0.40
codegen_flags: <defaults>
</compile_context>

<pallas_src>
import functools

import jax
import jax.numpy as jnp
from jax.experimental import pallas as pl
from jax.experimental.pallas import tpu as pltpu

MAX_SEQ_LEN = 128      # N (lane-dense output minor dim)
NUM_BUCKETS = 32       # ts_w has NUM_BUCKETS + 1 entries
BATCH = 4
BATCH_BLOCK = 2        # sequences per grid step -> grid = (BATCH // BATCH_BLOCK,) = (2,)


# ----------------------------- Pallas kernel -------------------------------
def _rel_bias_kernel(ts_next_ref, ts_ref, ts_w_ref, pos_bias_ref, out_ref, *,
                     num_buckets):
    # ts_next_ref : (Bt, N, 1) f32   ext_timestamps[b, i+1]
    # ts_ref      : (Bt, 1, N) f32   all_timestamps[b, j]
    # ts_w_ref    : (num_buckets+1,) f32 in SMEM
    # pos_bias_ref: (N, N) f32       pos_w[(N-1)+j-i]  (batch-invariant)
    # out_ref     : (Bt, N, N) f32
    d = ts_next_ref[...] - ts_ref[...]                       # (Bt, N, N) outer diff
    a = jnp.maximum(jnp.abs(d), 1.0)
    # bucketization_fn + clamp(0, num_buckets); .long() == floor for values >= 0
    bucket = jnp.clip(jnp.floor(jnp.log(a) / 0.301),
                      0.0, float(num_buckets)).astype(jnp.int32)

    # ts_w[bucket]: gather from the small SMEM table via a compare/select scan.
    def body(m, acc):
        return jnp.where(bucket == m, ts_w_ref[m], acc)

    ts_bias = jax.lax.fori_loop(0, num_buckets + 1, body, jnp.zeros_like(d))
    out_ref[...] = ts_bias + pos_bias_ref[...][None, :, :]


# ------------------------------- wrapper ------------------------------------
def relative_bucketed_bias_forward(all_timestamps, ts_w, pos_w, *, num_buckets,
                                    batch_block=BATCH_BLOCK):
    B, N = all_timestamps.shape
    assert B % batch_block == 0
    assert ts_w.shape == (num_buckets + 1,) and pos_w.shape == (2 * N - 1,)

    ts = all_timestamps.astype(jnp.float32)
    # ext_timestamps[:, 1:] == concat([ts[:, 1:], ts[:, N-1:N]], axis=1)
    ts_next = jnp.concatenate([ts[:, 1:], ts[:, N - 1:N]], axis=1)

    # Batch-invariant relative-position table pos_w[(N-1)+j-i]: static gather, done once.
    rel_idx = (N - 1) + jnp.arange(N)[None, :] - jnp.arange(N)[:, None]
    pos_bias = pos_w[rel_idx]                                  # (N, N)

    ts_next_col = ts_next.reshape(B, N, 1)   # broadcasts over j inside the kernel
    ts_row = ts.reshape(B, 1, N)             # broadcasts over i inside the kernel

    kernel = functools.partial(_rel_bias_kernel, num_buckets=num_buckets)
    return pl.pallas_call(
        kernel,
        out_shape=jax.ShapeDtypeStruct((B, N, N), jnp.float32),
        grid=(B // batch_block,),
        in_specs=[
            pl.BlockSpec((batch_block, N, 1), lambda b: (b, 0, 0)),
            pl.BlockSpec((batch_block, 1, N), lambda b: (b, 0, 0)),
            pl.BlockSpec(memory_space=pltpu.MemorySpace.SMEM),   # ts_w table
            pl.BlockSpec((N, N), lambda b: (0, 0)),              # pos_bias (shared)
        ],
        out_specs=pl.BlockSpec((batch_block, N, N), lambda b: (b, 0, 0)),
        compiler_params=pltpu.CompilerParams(
            dimension_semantics=("parallel",)),
    )(ts_next_col, ts_row, ts_w, pos_bias)


# ---------------------------- pure-JAX reference ----------------------------
def _bucketization_fn(x):
    # canonical HSTU: lambda x: (torch.log(torch.abs(x).clamp(min=1)) / 0.301).long()
    return jnp.floor(
        jnp.log(jnp.maximum(jnp.abs(x).astype(jnp.float32), 1.0)) / 0.301
    ).astype(jnp.int32)


def ref_forward(all_timestamps, ts_w, pos_w, *, num_buckets):
    """Literal JAX transcription of the PyTorch forward (pad/repeat/reshape trick)."""
    B, N = all_timestamps.shape
    t = jnp.pad(pos_w[: 2 * N - 1], (0, N))
    t = jnp.tile(t, N)[:-N].reshape(1, N, 3 * N - 2)
    r = (2 * N - 1) // 2
    ext = jnp.concatenate([all_timestamps, all_timestamps[:, N - 1:N]], axis=1)
    bucketed = jnp.clip(
        _bucketization_fn(ext[:, 1:, None] - ext[:, None, :-1]), 0, num_buckets)
    rel_pos_bias = t[:, :, r:-r]                                    # (1, N, N)
    rel_ts_bias = jnp.take(ts_w, bucketed.reshape(-1), axis=0).reshape(B, N, N)
    return rel_pos_bias + rel_ts_bias


# --------------------------------- main -------------------------------------
if __name__ == "__main__":
    N, NB, B = MAX_SEQ_LEN, NUM_BUCKETS, BATCH
    key = jax.random.PRNGKey(0)
    k_ts, k_tsw, k_posw = jax.random.split(key, 3)

    # Sorted integer timestamps in [0, 1000): every pairwise diff is an integer far
    # from any log-bucket boundary, so kernel (Mosaic log) and reference (XLA log)
    # produce identical buckets.
    all_timestamps = jnp.sort(
        jax.random.randint(k_ts, (B, N), 0, 1000, dtype=jnp.int32), axis=1)

    # parameters per __init__: normal_(mean=0, std=0.02)
    ts_w = 0.02 * jax.random.normal(k_tsw, (NB + 1,), dtype=jnp.float32)
    pos_w = 0.02 * jax.random.normal(k_posw, (2 * N - 1,), dtype=jnp.float32)

    y = relative_bucketed_bias_forward(all_timestamps, ts_w, pos_w, num_buckets=NB)
    y = jax.block_until_ready(y)

    y_ref = ref_forward(all_timestamps, ts_w, pos_w, num_buckets=NB)
    assert y.shape == (B, N, N)
    assert jnp.allclose(y, y_ref, atol=1e-5, rtol=1e-5), "mismatch vs reference"

    print("KERNEL_OK")
</pallas_src>

<mosaic_0001>
module attributes {stable_mosaic.version = 11 : i64} {
  func.func @_rel_bias_kernel(%arg0: i32, %arg1: memref<2x128x1xf32, #tpu.memory_space<vmem>>, %arg2: memref<2x1x128xf32, #tpu.memory_space<vmem>>, %arg3: memref<33xf32, #tpu.memory_space<smem>>, %arg4: memref<128x128xf32, #tpu.memory_space<vmem>>, %arg5: memref<2x128x128xf32, #tpu.memory_space<vmem>>) attributes {dimension_semantics = [#tpu.dimension_semantics<parallel>], iteration_bounds = array<i64: 2>, scalar_prefetch = 0 : i64, scratch_operands = 0 : i64, tpu.core_type = #tpu.core_type<tc>, window_params = [{transform_indices = @transform_0, window_bounds = array<i64: 2, 128, 1>}, {transform_indices = @transform_1, window_bounds = array<i64: 2, 1, 128>}, {transform_indices = @transform_2, window_bounds = array<i64: 33>}, {pipeline_mode = #tpu.pipeline_mode<synchronous>, transform_indices = @transform_3, window_bounds = array<i64: 128, 128>}, {transform_indices = @transform_4, window_bounds = array<i64: 2, 128, 128>}]} {
    %c0 = arith.constant 0 : index
    %c0_0 = arith.constant 0 : index
    %c0_1 = arith.constant 0 : index
    %0 = vector.load %arg1[%c0, %c0_0, %c0_1] : memref<2x128x1xf32, #tpu.memory_space<vmem>>, vector<2x128x1xf32>
    %c0_2 = arith.constant 0 : index
    %c0_3 = arith.constant 0 : index
    %c0_4 = arith.constant 0 : index
    %1 = vector.load %arg2[%c0_2, %c0_3, %c0_4] : memref<2x1x128xf32, #tpu.memory_space<vmem>>, vector<2x1x128xf32>
    %2 = vector.broadcast %0 : vector<2x128x1xf32> to vector<2x128x128xf32>
    %3 = vector.broadcast %1 : vector<2x1x128xf32> to vector<2x128x128xf32>
    %4 = arith.subf %2, %3 : vector<2x128x128xf32>
    %5 = math.absf %4 : vector<2x128x128xf32>
    %cst = arith.constant 1.000000e+00 : f32
    %6 = vector.broadcast %cst : f32 to vector<2x128x128xf32>
    %7 = arith.maximumf %5, %6 : vector<2x128x128xf32>
    %8 = math.log %7 : vector<2x128x128xf32>
    %cst_5 = arith.constant 3.010000e-01 : f32
    %9 = vector.broadcast %cst_5 : f32 to vector<2x128x128xf32>
    %10 = arith.divf %8, %9 : vector<2x128x128xf32>
    %11 = math.floor %10 : vector<2x128x128xf32>
    %cst_6 = arith.constant 0.000000e+00 : f32
    %cst_7 = arith.constant 3.200000e+01 : f32
    %12 = vector.broadcast %cst_6 : f32 to vector<2x128x128xf32>
    %13 = arith.maximumf %12, %11 : vector<2x128x128xf32>
    %14 = vector.broadcast %cst_7 : f32 to vector<2x128x128xf32>
    %15 = arith.minimumf %14, %13 : vector<2x128x128xf32>
    %16 = arith.fptosi %15 : vector<2x128x128xf32> to vector<2x128x128xi32>
    %cst_8 = arith.constant 0.000000e+00 : f32
    %17 = vector.broadcast %cst_8 : f32 to vector<2x128x128xf32>
    %c0_i32 = arith.constant 0 : i32
    %c33_i32 = arith.constant 33 : i32
    %18 = arith.addi %c0_i32, %c33_i32 : i32
    %c1_i32 = arith.constant 1 : i32
    %19 = scf.for %arg6 = %c0_i32 to %18 step %c1_i32 iter_args(%arg7 = %17) -> (vector<2x128x128xf32>)  : i32 {
      %25 = vector.broadcast %arg6 : i32 to vector<2x128x128xi32>
      %26 = arith.cmpi eq, %16, %25 : vector<2x128x128xi32>
      %27 = arith.index_cast %arg6 : i32 to index
      %28 = memref.load %arg3[%27] : memref<33xf32, #tpu.memory_space<smem>>
      %29 = vector.broadcast %28 : f32 to vector<2x128x128xf32>
      %30 = arith.select %26, %29, %arg7 : vector<2x128x128xi1>, vector<2x128x128xf32>
      scf.yield %30 : vector<2x128x128xf32>
    }
    %c33_i32_9 = arith.constant 33 : i32
    %c0_10 = arith.constant 0 : index
    %c0_11 = arith.constant 0 : index
    %20 = vector.load %arg4[%c0_10, %c0_11] : memref<128x128xf32, #tpu.memory_space<vmem>>, vector<128x128xf32>
    %21 = vector.shape_cast %20 : vector<128x128xf32> to vector<1x128x128xf32>
    %22 = vector.broadcast %21 : vector<1x128x128xf32> to vector<2x128x128xf32>
    %23 = arith.addf %19, %22 : vector<2x128x128xf32>
    %c0_12 = arith.constant 0 : index
    %c0_13 = arith.constant 0 : index
    %c0_14 = arith.constant 0 : index
    %24 = vector.load %arg5[%c0_12, %c0_13, %c0_14] : memref<2x128x128xf32, #tpu.memory_space<vmem>>, vector<2x128x128xf32>
    tpu.vector_store %arg5[%c0_12, %c0_13, %c0_14], %23 {strides = array<i32>} : memref<2x128x128xf32, #tpu.memory_space<vmem>>, vector<2x128x128xf32>,
    return
  }
  func.func @transform_0(%arg0: i32) -> (i32, i32, i32) {
    %c0_i32 = arith.constant 0 : i32
    %c0_i32_0 = arith.constant 0 : i32
    %c0_i32_1 = arith.constant 0 : i32
    return %arg0, %c0_i32, %c0_i32_0 : i32, i32, i32
  }
  func.func @transform_1(%arg0: i32) -> (i32, i32, i32) {
    %c0_i32 = arith.constant 0 : i32
    %c0_i32_0 = arith.constant 0 : i32
    %c0_i32_1 = arith.constant 0 : i32
    return %arg0, %c0_i32, %c0_i32_0 : i32, i32, i32
  }
  func.func @transform_2(%arg0: i32) -> i32 {
    %c0_i32 = arith.constant 0 : i32
    %c0_i32_0 = arith.constant 0 : i32
    return %c0_i32 : i32
  }
  func.func @transform_3(%arg0: i32) -> (i32, i32) {
    %c0_i32 = arith.constant 0 : i32
    %c0_i32_0 = arith.constant 0 : i32
    %c0_i32_1 = arith.constant 0 : i32
    return %c0_i32, %c0_i32_0 : i32, i32
  }
  func.func @transform_4(%arg0: i32) -> (i32, i32, i32) {
    %c0_i32 = arith.constant 0 : i32
    %c0_i32_0 = arith.constant 0 : i32
    %c0_i32_1 = arith.constant 0 : i32
    return %arg0, %c0_i32, %c0_i32_0 : i32, i32, i32
  }
}

</mosaic_0001>

<bundles_post_ra>
// kernel: tpu_custom_call.1
= control target key start
LH: loop header
LB: loop body
LE: loop exit
PB: predicated region body
PF: predicated region fallthrough
CT: control target
= control target key end

     0   :  { %9 = vsyncpa [#allocation4], 0  ;;  %s3056_s0 = inlined_call_operand.vmem [shape: f32[4,128,1], index: 0, kind: input, shape index: {}]   ;;  %s3057_s1 = inlined_call_operand.vmem [shape: f32[4,1,128], index: 1, kind: input, shape index: {}]   ;;  %s3058_s2 = inlined_call_operand.vmem [shape: f32[33], index: 2, kind: input, shape index: {}]   ;;  %s3059_s3 = inlined_call_operand.vmem [shape: f32[128,128], index: 3, kind: input, shape index: {}]   ;;  %s3060_s4 = inlined_call_operand.hbm [shape: f32[4,128,128], index: 4, kind: output, shape index: {}]  }
   0x1   :  { %10 = vsyncpa [#allocation3], 0 }
   0x2   :  { %12 = vsyncpa [#allocation3 + $0x1], 0  ;;  %s1992_s15 = smov 0   ;;  %s1994_s16 = smov 0  }
   0x3   :  { %s1996_s17 = smov 0   ;;  %s1998_s18 = smov 0  }
   0x4 LB: > { %s2013_s19 = sadd.s32 4294967295, %s1828_s18   ;;  %s1146_s20 = sadd.s32 4294967294, %s1828_s18   ;;  %s1828_s18 = sphi %s1998_s18, %s3378_s18   ;;  %s1824_s17 = sphi %s1996_s17, %s3377_s17   ;;  %s1820_s16 = sphi %s1994_s16, %s3376_s16   ;;  %s1816_s15 = sphi %s1992_s15, %s3375_s15  }
   0x5   : > { %s2017_s21 = sadd.s32 1, %s1828_s18   ;;  %s119_s22 = sadd.s32 1, %s1824_s17 }
   0x6   : > { %s116_s23 = ssub.s32 %s1828_s18, %s2017_s21  ;;  %p129_p0 = scmp.ne.s32.totalorder %s1824_s17, %s1820_s16 }
   0x7   : > { %p117_p1 = scmp.eq.s32.totalorder %s116_s23, 0  ;;  %p130_p2 = scmp.eq.s32.totalorder %s2013_s19, 1 }
   0x8   : > { %p135_p3 = scmp.ne.s32.totalorder %s1820_s16, %s1816_s15  ;;  %p136_p4 = scmp.eq.s32.totalorder %s1146_s20, 1 }
   0x9   : > { %s2028_s24 = scalar_select %p117_p1, %s1824_s17, %s119_s22  }
   0xa   : > { %p2030_p5 = por %p130_p2, %p129_p0  ;;  %p2034_p6 = por %p136_p4, %p135_p3 }
   0xb   : > { %p1147_p7 = scmp.ge.s32.totalorder %s1828_s18, 1  ;;  %p143_p8 = scmp.lt.s32.totalorder %s1828_s18, 3 }
   0xc   : > { %p1246_p9 = scmp.eq.s32.totalorder %s2013_s19, 0  ;;  %s156_s30 = sshll.u32 %s3058_s2, 4  ;;  %s157_s30 = int_to_ptr.vmem [resolvable:$true] %s156_s30 }
   0xd   : > { %p2041_p10 = pnand %p1147_p7, %p143_p8  ;;  %s1615_s5 = scalar_lea.vmem %s157_s30, 16 }
   0xe   : > { %p1616_p13 = scmp.ne.s32.totalorder %s157_s30, %s1615_s5  ;;  %p1623_p3 = scmp.lt.s32.totalorder %s157_s30, %s157_s30 }
   0xf   : > { %p1238_p11 = pneg %p2041_p10  ;;  %p1624_p4 = scmp.lt.s32.totalorder %s1615_s5, %s1615_s5 }
  0x11   : > { %p1239_p12 = pnand %p1246_p9, %p1238_p11  ;;  %p1625_p7 = por %p1624_p4, %p1623_p3 }
  0x13   : > { %p1617_p0 = pneg %p1239_p12 }
  0x15   : > { %p1618_p1 = pnand %p1617_p0, %p1616_p13 }
  0x17   : > { %p1619_p2 = pneg %p1618_p1 }
  0x19   : > { %p1626_p8 = pnand %p1625_p7, %p1619_p2 }
  0x1b   : > { %1629 = shalt.err (!%p1626_p8)
}
  0x1c   : > { %s1962_s6 = smov [#allocation2]   ;;  %190 = sbr.rel (%p2041_p10) target bundleno = 367 (0x16f), region = 36 }
  0x1d   : > { %1241 = dma.vmem_to_smem (!%p1239_p12), %s157_s30, 16, %s1962_s6, [#allocation4]  }
  0x23   : > { %1807 = dma.done.wait (%p1246_p9), [#allocation4], 16  }
  0x24   : > { %1809 = vsyncadd (%p1246_p9), [#allocation4], 4294967280 }
  0x25   : > { %196 = sfence }
  0x26   : > { %s1153_s7 = sshll.u32 %s2013_s19, 1  ;;  %v1963_v0 = vmov 0   ;;  %s219_s12 = sand.u32 1, %s1820_s16  }
  0x27   : > { %1550 = vset.pattern.permute.xlu1 %v1963_v0  ;;  %1549 = vset.pattern.permute.xlu0 %v1963_v0  ;;  %p223_p11 = scmp.lt.s32.totalorder %s1153_s7, 3  ;;  %s2102_s13 = sshll.u32 %s219_s12, 8 }
  0x28   : > { %s2271_s23 = scalar_lea.vmem [#allocation5], %s2102_s13  ;;  %s2337_s27 = smov 0  }
  0x29   : > { %s3380_s7 = smov (!%p223_p11, %s1153_s7), 3 }
  0x2a   : > { %s1165_s8 = sshll.u32 %s3380_s7, 7  ;;  %s2108_s22 = scalar_lea.vmem %s3057_s1, %s3380_s7 }
  0x2b   : > { %s2065_s11 = scalar_lea.vmem %s3056_s0, %s1165_s8  ;;  %v2111_v33 = vld [vmem:[%s2108_s22] ss:$0 sm:$0xff] }
  0x2c   : > { %v237_v1 = vld [vmem:[%s2065_s11 + $0x10] sm:$0xff]  ;;  %v235_v2 = vld [vmem:[%s2065_s11] sm:$0xff]  ;;  %v238_v3 = vld [vmem:[%s2065_s11 + $0x18] sm:$0xff] }
  0x2d   : > { %281 = vperm.xlu1 %1550, %v237_v1   ;;  %271 = vperm.xlu0 %1549, %v235_v2   ;;  %v236_v4 = vld [vmem:[%s2065_s11 + $0x8] sm:$0xff]  ;;  %v239_v6 = vld [vmem:[%s2065_s11 + $0x20] sm:$0xff]  ;;  %v242_v7 = vld [vmem:[%s2065_s11 + $0x38] sm:$0xff] }
  0x2e   : > { %v240_v5 = vld [vmem:[%s2065_s11 + $0x28] sm:$0xff]  ;;  %v241_v8 = vld [vmem:[%s2065_s11 + $0x30] sm:$0xff]  ;;  %v243_v10 = vld [vmem:[%s2065_s11 + $0x40] sm:$0xff] }
  0x2f   : > { %v244_v9 = vld [vmem:[%s2065_s11 + $0x48] sm:$0xff]  ;;  %v246_v11 = vld [vmem:[%s2065_s11 + $0x58] sm:$0xff]  ;;  %v245_v12 = vld [vmem:[%s2065_s11 + $0x50] sm:$0xff] }
  0x30   : > { %v248_v13 = vld [vmem:[%s2065_s11 + $0x68] sm:$0xff]  ;;  %v247_v14 = vld [vmem:[%s2065_s11 + $0x60] sm:$0xff]  ;;  %v250_v15 = vld [vmem:[%s2065_s11 + $0x78] sm:$0xff] }
  0x31   : > { %286 = vperm.xlu1 %1550, %v238_v3   ;;  %276 = vperm.xlu0 %1549, %v236_v4   ;;  %v249_v16 = vld [vmem:[%s2065_s11 + $0x70] sm:$0xff]  ;;  %v252_v17 = vld [vmem:[%s2065_s11 + $0x88] sm:$0xff]  ;;  %v251_v18 = vld [vmem:[%s2065_s11 + $0x80] sm:$0xff] }
  0x32   : > { %v254_v19 = vld [vmem:[%s2065_s11 + $0x98] sm:$0xff]  ;;  %v253_v20 = vld [vmem:[%s2065_s11 + $0x90] sm:$0xff]  ;;  %v256_v21 = vld [vmem:[%s2065_s11 + $0xa8] sm:$0xff] }
  0x33   : > { %v255_v22 = vld [vmem:[%s2065_s11 + $0xa0] sm:$0xff]  ;;  %v258_v23 = vld [vmem:[%s2065_s11 + $0xb8] sm:$0xff]  ;;  %v257_v24 = vld [vmem:[%s2065_s11 + $0xb0] sm:$0xff] }
  0x34   : > { %v260_v25 = vld [vmem:[%s2065_s11 + $0xc8] sm:$0xff]  ;;  %v259_v26 = vld [vmem:[%s2065_s11 + $0xc0] sm:$0xff]  ;;  %v262_v27 = vld [vmem:[%s2065_s11 + $0xd8] sm:$0xff] }
  0x35   : > { %296 = vperm.xlu1 %1550, %v240_v5   ;;  %291 = vperm.xlu0 %1549, %v239_v6   ;;  %v261_v28 = vld [vmem:[%s2065_s11 + $0xd0] sm:$0xff]  ;;  %v264_v29 = vld [vmem:[%s2065_s11 + $0xe8] sm:$0xff]  ;;  %v263_v30 = vld [vmem:[%s2065_s11 + $0xe0] sm:$0xff] }
  0x36   : > { %v266_v31 = vld [vmem:[%s2065_s11 + $0xf8] sm:$0xff]  ;;  %v265_v32 = vld [vmem:[%s2065_s11 + $0xf0] sm:$0xff] }
  0x39   : > { %306 = vperm.xlu1 %1550, %v242_v7   ;;  %301 = vperm.xlu0 %1549, %v241_v8  }
  0x3d   : > { %316 = vperm.xlu1 %1550, %v244_v9   ;;  %311 = vperm.xlu0 %1549, %v243_v10  }
  0x41   : > { %326 = vperm.xlu1 %1550, %v246_v11   ;;  %321 = vperm.xlu0 %1549, %v245_v12  }
  0x45   : > { %336 = vperm.xlu1 %1550, %v248_v13   ;;  %331 = vperm.xlu0 %1549, %v247_v14  }
  0x49   : > { %346 = vperm.xlu1 %1550, %v250_v15   ;;  %341 = vperm.xlu0 %1549, %v249_v16  }
  0x4d   : > { %356 = vperm.xlu1 %1550, %v252_v17   ;;  %351 = vperm.xlu0 %1549, %v251_v18  }
  0x51   : > { %366 = vperm.xlu1 %1550, %v254_v19   ;;  %361 = vperm.xlu0 %1549, %v253_v20  }
  0x55   : > { %376 = vperm.xlu1 %1550, %v256_v21   ;;  %371 = vperm.xlu0 %1549, %v255_v22  }
  0x59   : > { %386 = vperm.xlu1 %1550, %v258_v23   ;;  %381 = vperm.xlu0 %1549, %v257_v24  }
  0x5d   : > { %396 = vperm.xlu1 %1550, %v260_v25   ;;  %391 = vperm.xlu0 %1549, %v259_v26  }
  0x61   : > { %406 = vperm.xlu1 %1550, %v262_v27   ;;  %401 = vperm.xlu0 %1549, %v261_v28  }
  0x65   : > { %416 = vperm.xlu1 %1550, %v264_v29   ;;  %411 = vperm.xlu0 %1549, %v263_v30  }
  0x69   : > { %426 = vperm.xlu1 %1550, %v266_v31   ;;  %421 = vperm.xlu0 %1549, %v265_v32  }
  0xac   : > { %v282_v34 = vpop.permute.xlu1 %281  ;;  %v272_v35 = vpop.permute.xlu0 %271 }
  0xad   : > { %v443_v36 = vsub.f32 %v282_v34, %v2111_v33  ;;  %v441_v37 = vsub.f32 %v272_v35, %v2111_v33 }
  0xaf   : > { %v475_v38 = vand.u32 2147483647, %v443_v36  ;;  %v473_v39 = vand.u32 2147483647, %v441_v37 }
  0xb0   : > { %v287_v40 = vpop.permute.xlu1 %286  ;;  %v277_v41 = vpop.permute.xlu0 %276 }
  0xb1   : > { %v507_v42 = vmax.f32 %v475_v38, 1.0  ;;  %v505_v43 = vmax.f32 %v473_v39, 1.0  ;;  %v444_v44 = vsub.f32 %v287_v40, %v2111_v33  ;;  %v442_v45 = vsub.f32 %v277_v41, %v2111_v33 }
  0xb3   : > { %1551 = vlog2.f32 %v507_v42  ;;  %v476_v46 = vand.u32 2147483647, %v444_v44  ;;  %v474_v47 = vand.u32 2147483647, %v442_v45 }
  0xb4   : > { %1553 = vlog2.f32 %v505_v43  ;;  %v297_v48 = vpop.permute.xlu1 %296  ;;  %v292_v49 = vpop.permute.xlu0 %291 }
  0xb5   : > { %v508_v50 = vmax.f32 %v476_v46, 1.0  ;;  %v506_v51 = vmax.f32 %v474_v47, 1.0  ;;  %v446_v52 = vsub.f32 %v297_v48, %v2111_v33  ;;  %v445_v53 = vsub.f32 %v292_v49, %v2111_v33 }
  0xb7   : > { %1555 = vlog2.f32 %v508_v50  ;;  %v478_v54 = vand.u32 2147483647, %v446_v52  ;;  %v477_v55 = vand.u32 2147483647, %v445_v53 }
  0xb8   : > { %1557 = vlog2.f32 %v506_v51  ;;  %v307_v56 = vpop.permute.xlu1 %306  ;;  %v302_v57 = vpop.permute.xlu0 %301 }
  0xb9   : > { %v510_v58 = vmax.f32 %v478_v54, 1.0  ;;  %v509_v59 = vmax.f32 %v477_v55, 1.0  ;;  %v448_v60 = vsub.f32 %v307_v56, %v2111_v33  ;;  %v447_v61 = vsub.f32 %v302_v57, %v2111_v33 }
  0xba   : > { %v2331_v57 = vmov 0.0  }
  0xbb   : > { %1559 = vlog2.f32 %v510_v58  ;;  %v480_v62 = vand.u32 2147483647, %v448_v60  ;;  %v479_v63 = vand.u32 2147483647, %v447_v61  ;;  %v2335_v61 = vmov 0.0  }
  0xbc   : > { %1561 = vlog2.f32 %v509_v59  ;;  %v317_v0 = vpop.permute.xlu1 %316  ;;  %v312_v1 = vpop.permute.xlu0 %311 }
  0xbd   : > { %v1552_v2 = vpop.eup %1551  ;;  %v512_v3 = vmax.f32 %v480_v62, 1.0  ;;  %v511_v4 = vmax.f32 %v479_v63, 1.0  ;;  %v450_v5 = vsub.f32 %v317_v0, %v2111_v33  ;;  %v449_v6 = vsub.f32 %v312_v1, %v2111_v33 }
  0xbe   : > { %v1554_v7 = vpop.eup %1553  ;;  %v542_v8 = vmul.f32 0.6931472, %v1552_v2 }
  0xbf   : > { %v538_v9 = vmul.f32 0.6931472, %v1554_v7  ;;  %1563 = vlog2.f32 %v512_v3  ;;  %v482_v10 = vand.u32 2147483647, %v450_v5  ;;  %v481_v11 = vand.u32 2147483647, %v449_v6 }
  0xc0   : > { %v604_v12 = vmul.f32 3.3222592, %v542_v8  ;;  %1565 = vlog2.f32 %v511_v4  ;;  %v327_v13 = vpop.permute.xlu1 %326  ;;  %v322_v14 = vpop.permute.xlu0 %321 }
  0xc1   : > { %v1556_v15 = vpop.eup %1555  ;;  %v602_v16 = vmul.f32 3.3222592, %v538_v9  ;;  %v514_v17 = vmax.f32 %v482_v10, 1.0  ;;  %v513_v18 = vmax.f32 %v481_v11, 1.0  ;;  %v452_v19 = vsub.f32 %v327_v13, %v2111_v33 }
  0xc2   : > { %v1558_v20 = vpop.eup %1557  ;;  %v636_v21 = vfloor.f32 %v604_v12  ;;  %v544_v22 = vmul.f32 0.6931472, %v1556_v15  ;;  %v451_v23 = vsub.f32 %v322_v14, %v2111_v33  ;;  %v2329_v13 = vmov 0.0  }
  0xc3   : > { %v634_v24 = vfloor.f32 %v602_v16  ;;  %v540_v25 = vmul.f32 0.6931472, %v1558_v20  ;;  %1567 = vlog2.f32 %v514_v17  ;;  %v484_v26 = vand.u32 2147483647, %v452_v19 }
  0xc4   : > { %v668_v27 = vmax.f32 %v636_v21, 0.0  ;;  %v605_v28 = vmul.f32 3.3222592, %v544_v22  ;;  %1569 = vlog2.f32 %v513_v18  ;;  %v483_v29 = vand.u32 2147483647, %v451_v23  ;;  %v337_v30 = vpop.permute.xlu1 %336  ;;  %v2125_v31 = vpop.permute.xlu0 %331 }
  0xc5   : > { %v1560_v32 = vpop.eup %1559  ;;  %v666_v34 = vmax.f32 %v634_v24, 0.0  ;;  %v603_v35 = vmul.f32 3.3222592, %v540_v25  ;;  %v516_v36 = vmax.f32 %v484_v26, 1.0  ;;  %v454_v37 = vsub.f32 %v337_v30, %v2111_v33 }
  0xc6   : > { %v1562_v38 = vpop.eup %1561  ;;  %v700_v39 = vmin.f32 %v668_v27, 32.0  ;;  %v637_v40 = vfloor.f32 %v605_v28  ;;  %v548_v41 = vmul.f32 0.6931472, %v1560_v32  ;;  %v515_v42 = vmax.f32 %v483_v29, 1.0 }
  0xc7   : > { %v698_v43 = vmin.f32 %v666_v34, 32.0  ;;  %v635_v44 = vfloor.f32 %v603_v35  ;;  %v546_v45 = vmul.f32 0.6931472, %v1562_v38  ;;  %1571 = vlog2.f32 %v516_v36 }
  0xc8   : > { %v2128_v46 = vtrunc.f32 %v700_v39  ;;  %v669_v47 = vmax.f32 %v637_v40, 0.0  ;;  %v607_v48 = vmul.f32 3.3222592, %v548_v41  ;;  %1573 = vlog2.f32 %v515_v42  ;;  %v2130_v49 = vpop.permute.xlu1 %346  ;;  %v2132_v50 = vpop.permute.xlu0 %341 }
  0xc9   : > { %v1564_v51 = vpop.eup %1563  ;;  %v2134_v52 = vtrunc.f32 %v698_v43  ;;  %v667_v53 = vmax.f32 %v635_v44, 0.0  ;;  %v606_v54 = vmul.f32 3.3222592, %v546_v45  ;;  %v486_v55 = vand.u32 2147483647, %v454_v37 }
  0xca   : > { %3101 = vst [vmem:[#allocation8_spill] sm:$0xff] %v2128_v46  ;;  %v1566_v56 = vpop.eup %1565  ;;  %v701_v58 = vmin.f32 %v669_v47, 32.0  ;;  %v639_v59 = vfloor.f32 %v607_v48  ;;  %v552_v60 = vmul.f32 0.6931472, %v1564_v51  ;;  %v453_v11 = vsub.f32 %v2125_v31, %v2111_v33 }
  0xcb   : > { %3102 = vst [vmem:[#allocation9_spill] sm:$0xff] %v2134_v52  ;;  %v699_v62 = vmin.f32 %v667_v53, 32.0  ;;  %v638_v63 = vfloor.f32 %v606_v54  ;;  %v550_v0 = vmul.f32 0.6931472, %v1566_v56  ;;  %v518_v4 = vmax.f32 %v486_v55, 1.0 }
  0xcc   : > { %v2138_v1 = vtrunc.f32 %v701_v58  ;;  %v671_v2 = vmax.f32 %v639_v59, 0.0  ;;  %v609_v3 = vmul.f32 3.3222592, %v552_v60  ;;  %v2140_v5 = vpop.permute.xlu1 %356  ;;  %v2142_v6 = vpop.permute.xlu0 %351  ;;  %v485_v30 = vand.u32 2147483647, %v453_v11 }
  0xcd   : > { %v1568_v7 = vpop.eup %1567  ;;  %v2144_v8 = vtrunc.f32 %v699_v62  ;;  %v670_v9 = vmax.f32 %v638_v63, 0.0  ;;  %v608_v10 = vmul.f32 3.3222592, %v550_v0  ;;  %1575 = vlog2.f32 %v518_v4  ;;  %v2167_v55 = vld [vmem:[%s2108_s22 + $0x1] ss:$0 sm:$0xff] }
  0xce   : > { %3103 = vst [vmem:[#allocation10_spill] sm:$0xff] %v2138_v1  ;;  %v1570_v12 = vpop.eup %1569  ;;  %v703_v14 = vmin.f32 %v671_v2, 32.0  ;;  %v641_v15 = vfloor.f32 %v609_v3  ;;  %v556_v16 = vmul.f32 0.6931472, %v1568_v7  ;;  %v517_v44 = vmax.f32 %v485_v30, 1.0 }
  0xcf   : > { %3104 = vst [vmem:[#allocation11_spill] sm:$0xff] %v2144_v8  ;;  %v702_v18 = vmin.f32 %v670_v9, 32.0  ;;  %v640_v19 = vfloor.f32 %v608_v10  ;;  %v554_v20 = vmul.f32 0.6931472, %v1570_v12  ;;  %v456_v54 = vsub.f32 %v2130_v49, %v2111_v33 }
  0xd0   : > { %v2150_v21 = vtrunc.f32 %v703_v14  ;;  %v673_v22 = vmax.f32 %v641_v15, 0.0  ;;  %v611_v23 = vmul.f32 3.3222592, %v556_v16  ;;  %v2152_v24 = vpop.permute.xlu1 %366  ;;  %v2154_v25 = vpop.permute.xlu0 %361  ;;  %1577 = vlog2.f32 %v517_v44 }
  0xd1   : > { %v1572_v26 = vpop.eup %1571  ;;  %v2156_v27 = vtrunc.f32 %v702_v18  ;;  %v672_v28 = vmax.f32 %v640_v19, 0.0  ;;  %v610_v29 = vmul.f32 3.3222592, %v554_v20  ;;  %v488_v0 = vand.u32 2147483647, %v456_v54 }
  0xd2   : > { %3105 = vst [vmem:[#allocation12_spill] sm:$0xff] %v2150_v21  ;;  %v1574_v31 = vpop.eup %1573  ;;  %v705_v34 = vmin.f32 %v673_v22, 32.0  ;;  %v643_v35 = vfloor.f32 %v611_v23  ;;  %v560_v36 = vmul.f32 0.6931472, %v1572_v26  ;;  %v455_v4 = vsub.f32 %v2132_v50, %v2111_v33 }
  0xd3   : > { %3106 = vst [vmem:[#allocation13_spill] sm:$0xff] %v2156_v27  ;;  %v704_v38 = vmin.f32 %v672_v28, 32.0  ;;  %v642_v39 = vfloor.f32 %v610_v29  ;;  %v558_v40 = vmul.f32 0.6931472, %v1574_v31  ;;  %v458_v49 = vsub.f32 %v2140_v5, %v2167_v55 }
  0xd4   : > { %v2160_v41 = vtrunc.f32 %v705_v34  ;;  %v675_v42 = vmax.f32 %v643_v35, 0.0  ;;  %v613_v43 = vmul.f32 3.3222592, %v560_v36  ;;  %v377_v45 = vpop.permute.xlu1 %376  ;;  %v372_v47 = vpop.permute.xlu0 %371  ;;  %v520_v10 = vmax.f32 %v488_v0, 1.0 }
  0xd5   : > { %v2162_v48 = vtrunc.f32 %v704_v38  ;;  %v674_v51 = vmax.f32 %v642_v39, 0.0  ;;  %v612_v53 = vmul.f32 3.3222592, %v558_v40  ;;  %v457_v11 = vsub.f32 %v2142_v6, %v2167_v55 }
  0xd6   : > { %3107 = vst [vmem:[#allocation14_spill] sm:$0xff] %v2160_v41  ;;  %v707_v58 = vmin.f32 %v675_v42, 32.0  ;;  %v645_v59 = vfloor.f32 %v613_v43  ;;  %v487_v18 = vand.u32 2147483647, %v455_v4  ;;  %v490_v19 = vand.u32 2147483647, %v458_v49 }
  0xd7   : > { %3108 = vst [vmem:[#allocation15_spill] sm:$0xff] %v2162_v48  ;;  %v706_v62 = vmin.f32 %v674_v51, 32.0  ;;  %v644_v63 = vfloor.f32 %v612_v53  ;;  %v1576_v14 = vpop.eup %1575  ;;  %1579 = vlog2.f32 %v520_v10  ;;  %v489_v28 = vand.u32 2147483647, %v457_v11 }
  0xd8   : > { %v2171_v2 = vtrunc.f32 %v707_v58  ;;  %v677_v3 = vmax.f32 %v645_v59, 0.0  ;;  %v387_v12 = vpop.permute.xlu1 %386  ;;  %v382_v20 = vpop.permute.xlu0 %381  ;;  %v564_v22 = vmul.f32 0.6931472, %v1576_v14  ;;  %v519_v23 = vmax.f32 %v487_v18, 1.0 }
  0xd9   : > { %v2177_v7 = vtrunc.f32 %v706_v62  ;;  %v676_v9 = vmax.f32 %v644_v63, 0.0  ;;  %v522_v26 = vmax.f32 %v490_v19, 1.0  ;;  %v460_v30 = vsub.f32 %v2152_v24, %v2167_v55 }
  0xda   : > { %3109 = vst [vmem:[#allocation16_spill] sm:$0xff] %v2171_v2  ;;  %v709_v16 = vmin.f32 %v677_v3, 32.0  ;;  %v615_v6 = vmul.f32 3.3222592, %v564_v22  ;;  %v459_v31 = vsub.f32 %v2154_v25, %v2167_v55  ;;  %1581 = vlog2.f32 %v519_v23  ;;  %v1578_v43 = vpop.eup %1577 }
  0xdb   : > { %3110 = vst [vmem:[#allocation17_spill] sm:$0xff] %v2177_v7  ;;  %v708_v50 = vmin.f32 %v676_v9, 32.0  ;;  %v521_v35 = vmax.f32 %v489_v28, 1.0  ;;  %v462_v36 = vsub.f32 %v377_v45, %v2167_v55  ;;  %1583 = vlog2.f32 %v522_v26 }
  0xdc   : > { %v2183_v5 = vtrunc.f32 %v709_v16  ;;  %v647_v39 = vfloor.f32 %v615_v6  ;;  %v492_v40 = vand.u32 2147483647, %v460_v30  ;;  %v397_v42 = vpop.permute.xlu1 %396  ;;  %v491_v44 = vand.u32 2147483647, %v459_v31  ;;  %v392_v53 = vpop.permute.xlu0 %391 }
  0xdd   : > { %v2185_v29 = vtrunc.f32 %v708_v50  ;;  %1585 = vlog2.f32 %v521_v35  ;;  %v494_v51 = vand.u32 2147483647, %v462_v36  ;;  %v461_v24 = vsub.f32 %v372_v47, %v2167_v55 }
  0xde   : > { %3111 = vst [vmem:[#allocation18_spill] sm:$0xff] %v2183_v5  ;;  %v679_v25 = vmax.f32 %v647_v39, 0.0  ;;  %v562_v54 = vmul.f32 0.6931472, %v1578_v43  ;;  %v524_v58 = vmax.f32 %v492_v40, 1.0  ;;  %v464_v59 = vsub.f32 %v387_v12, %v2167_v55 }
  0xdf   : > { %3112 = vst [vmem:[#allocation19_spill] sm:$0xff] %v2185_v29  ;;  %v523_v62 = vmax.f32 %v491_v44, 1.0  ;;  %v526_v45 = vmax.f32 %v494_v51, 1.0  ;;  %v493_v63 = vand.u32 2147483647, %v461_v24  ;;  %v463_v0 = vsub.f32 %v382_v20, %v2167_v55 }
  0xe0   : > { %v711_v3 = vmin.f32 %v679_v25, 32.0  ;;  %v614_v4 = vmul.f32 3.3222592, %v562_v54  ;;  %1587 = vlog2.f32 %v524_v58  ;;  %v496_v49 = vand.u32 2147483647, %v464_v59  ;;  %v407_v18 = vpop.permute.xlu1 %406  ;;  %v402_v22 = vpop.permute.xlu0 %401 }
  0xe1   : > { %1589 = vlog2.f32 %v523_v62  ;;  %v525_v9 = vmax.f32 %v493_v63, 1.0  ;;  %v495_v10 = vand.u32 2147483647, %v463_v0  ;;  %v466_v47 = vsub.f32 %v397_v42, %v2167_v55  ;;  %v1580_v11 = vpop.eup %1579 }
  0xe2   : > { %v2198_v14 = vtrunc.f32 %v711_v3  ;;  %v646_v16 = vfloor.f32 %v614_v4  ;;  %1591 = vlog2.f32 %v526_v45  ;;  %v528_v12 = vmax.f32 %v496_v49, 1.0 }
  0xe3   : > { %v568_v19 = vmul.f32 0.6931472, %v1580_v11  ;;  %1593 = vlog2.f32 %v525_v9  ;;  %v527_v50 = vmax.f32 %v495_v10, 1.0  ;;  %v498_v20 = vand.u32 2147483647, %v466_v47 }
  0xe4   : > { %3113 = vst [vmem:[#allocation20_spill] sm:$0xff] %v2198_v14  ;;  %v678_v26 = vmax.f32 %v646_v16, 0.0  ;;  %1595 = vlog2.f32 %v528_v12  ;;  %v465_v28 = vsub.f32 %v392_v53, %v2167_v55  ;;  %v1582_v6 = vpop.eup %1581  ;;  %v468_v35 = vsub.f32 %v407_v18, %v2167_v55 }
  0xe5   : > { %v617_v30 = vmul.f32 3.3222592, %v568_v19  ;;  %1597 = vlog2.f32 %v527_v50  ;;  %v530_v31 = vmax.f32 %v498_v20, 1.0  ;;  %v1584_v36 = vpop.eup %1583  ;;  %v566_v40 = vmul.f32 0.6931472, %v1582_v6 }
  0xe6   : > { %v710_v39 = vmin.f32 %v678_v26, 32.0  ;;  %v497_v42 = vand.u32 2147483647, %v465_v28  ;;  %v467_v43 = vsub.f32 %v402_v22, %v2167_v55  ;;  %v572_v24 = vmul.f32 0.6931472, %v1584_v36 }
  0xe7   : > { %v1586_v44 = vpop.eup %1585  ;;  %v649_v51 = vfloor.f32 %v617_v30  ;;  %1599 = vlog2.f32 %v530_v31  ;;  %v500_v25 = vand.u32 2147483647, %v468_v35  ;;  %v616_v53 = vmul.f32 3.3222592, %v566_v40 }
  0xe8   : > { %v2204_v54 = vtrunc.f32 %v710_v39  ;;  %v570_v58 = vmul.f32 0.6931472, %v1586_v44  ;;  %v529_v59 = vmax.f32 %v497_v42, 1.0  ;;  %v619_v45 = vmul.f32 3.3222592, %v572_v24 }
  0xe9   : > { %v681_v62 = vmax.f32 %v649_v51, 0.0  ;;  %v532_v63 = vmax.f32 %v500_v25, 1.0  ;;  %v2206_v0 = vand.u32 2147483647, %v467_v43  ;;  %v648_v49 = vfloor.f32 %v616_v53 }
  0xea   : > { %3114 = vst [vmem:[#allocation21_spill] sm:$0xff] %v2204_v54  ;;  %v1588_v3 = vpop.eup %1587  ;;  %v618_v9 = vmul.f32 3.3222592, %v570_v58  ;;  %1601 = vlog2.f32 %v529_v59  ;;  %v651_v11 = vfloor.f32 %v619_v45  ;;  %v2309_v23 = vmov 0.0  }
  0xeb   : > { %v1590_v10 = vpop.eup %1589  ;;  %v713_v47 = vmin.f32 %v681_v62, 32.0  ;;  %v576_v16 = vmul.f32 0.6931472, %v1588_v3  ;;  %1603 = vlog2.f32 %v532_v63  ;;  %v680_v18 = vmax.f32 %v648_v49, 0.0 }
  0xec   : > { %v1592_v12 = vpop.eup %1591  ;;  %v650_v19 = vfloor.f32 %v618_v9  ;;  %v574_v50 = vmul.f32 0.6931472, %v1590_v10  ;;  %v531_v20 = vmax.f32 %v2206_v0, 1.0  ;;  %v683_v28 = vmax.f32 %v651_v11, 0.0 }
  0xed   : > { %v1594_v22 = vpop.eup %1593  ;;  %v2210_v26 = vtrunc.f32 %v713_v47  ;;  %v621_v6 = vmul.f32 3.3222592, %v576_v16  ;;  %v580_v30 = vmul.f32 0.6931472, %v1592_v12  ;;  %v712_v35 = vmin.f32 %v680_v18, 32.0 }
  0xee   : > { %v1596_v31 = vpop.eup %1595  ;;  %v682_v36 = vmax.f32 %v650_v19, 0.0  ;;  %v620_v39 = vmul.f32 3.3222592, %v574_v50  ;;  %v578_v40 = vmul.f32 0.6931472, %v1594_v22  ;;  %v715_v44 = vmin.f32 %v683_v28, 32.0  ;;  %v417_v50 = vpop.permute.xlu1 %416 }
  0xef   : > { %3115 = vst [vmem:[#allocation22_spill] sm:$0xff] %v2210_v26  ;;  %v1598_v42 = vpop.eup %1597  ;;  %v653_v51 = vfloor.f32 %v621_v6  ;;  %v623_v24 = vmul.f32 3.3222592, %v580_v30  ;;  %v2213_v25 = vtrunc.f32 %v712_v35  ;;  %v584_v49 = vmul.f32 0.6931472, %v1596_v31 }
  0xf0   : > { %v714_v53 = vmin.f32 %v682_v36, 32.0  ;;  %v652_v58 = vfloor.f32 %v620_v39  ;;  %v622_v59 = vmul.f32 3.3222592, %v578_v40  ;;  %v2215_v45 = vtrunc.f32 %v715_v44 }
  0xf1   : > { %3116 = vst [vmem:[#allocation23_spill] sm:$0xff] %v2213_v25  ;;  %v1600_v62 = vpop.eup %1599  ;;  %v685_v63 = vmax.f32 %v653_v51, 0.0  ;;  %v655_v3 = vfloor.f32 %v623_v24  ;;  %v625_v19 = vmul.f32 3.3222592, %v584_v49  ;;  %v582_v35 = vmul.f32 0.6931472, %v1598_v42 }
  0xf2   : > { %3117 = vst [vmem:[#allocation24_spill] sm:$0xff] %v2215_v45  ;;  %v2218_v10 = vtrunc.f32 %v714_v53  ;;  %v684_v47 = vmax.f32 %v652_v58, 0.0  ;;  %v654_v11 = vfloor.f32 %v622_v59  ;;  %v588_v44 = vmul.f32 0.6931472, %v1600_v62  ;;  %v412_v59 = vpop.permute.xlu0 %411 }
  0xf3   : > { %v717_v12 = vmin.f32 %v685_v63, 32.0  ;;  %v687_v18 = vmax.f32 %v655_v3, 0.0  ;;  %v657_v40 = vfloor.f32 %v625_v19  ;;  %v624_v53 = vmul.f32 3.3222592, %v582_v35  ;;  %v427_v35 = vpop.permute.xlu1 %426 }
  0xf4   : > { %3118 = vst [vmem:[#allocation25_spill] sm:$0xff] %v2218_v10  ;;  %v1602_v22 = vpop.eup %1601  ;;  %v716_v6 = vmin.f32 %v684_v47, 32.0  ;;  %v686_v30 = vmax.f32 %v654_v11, 0.0  ;;  %v627_v47 = vmul.f32 3.3222592, %v588_v44  ;;  %1605 = vlog2.f32 %v531_v20 }
  0xf5   : > { %v1604_v36 = vpop.eup %1603  ;;  %v2222_v31 = vtrunc.f32 %v717_v12  ;;  %v719_v39 = vmin.f32 %v687_v18, 32.0  ;;  %v586_v58 = vmul.f32 0.6931472, %v1602_v22  ;;  %v689_v49 = vmax.f32 %v657_v40, 0.0 }
  0xf6   : > { %v2224_v51 = vtrunc.f32 %v716_v6  ;;  %v718_v24 = vmin.f32 %v686_v30, 32.0  ;;  %v656_v12 = vfloor.f32 %v624_v53  ;;  %v659_v6 = vfloor.f32 %v627_v47  ;;  %v422_v47 = vpop.permute.xlu0 %421 }
  0xf7   : > { %3119 = vst [vmem:[#allocation26_spill] sm:$0xff] %v2222_v31  ;;  %v2227_v3 = vtrunc.f32 %v719_v39  ;;  %v626_v18 = vmul.f32 3.3222592, %v586_v58  ;;  %v721_v19 = vmin.f32 %v689_v49, 32.0  ;;  %v592_v30 = vmul.f32 0.6931472, %v1604_v36 }
  0xf8   : > { %3120 = vst [vmem:[#allocation27_spill] sm:$0xff] %v2224_v51  ;;  %v2230_v11 = vtrunc.f32 %v718_v24  ;;  %v688_v16 = vmax.f32 %v656_v12, 0.0  ;;  %v691_v40 = vmax.f32 %v659_v6, 0.0  ;;  %v470_v24 = vsub.f32 %v417_v50, %v2167_v55 }
  0xf9   : > { %3121 = vst [vmem:[#allocation28_spill] sm:$0xff] %v2227_v3  ;;  %v658_v63 = vfloor.f32 %v626_v18  ;;  %v2236_v39 = vtrunc.f32 %v721_v19  ;;  %v629_v44 = vmul.f32 3.3222592, %v592_v30  ;;  %v469_v49 = vsub.f32 %v412_v59, %v2167_v55 }
  0xfa   : > { %3122 = vst [vmem:[#allocation29_spill] sm:$0xff] %v2230_v11  ;;  %v720_v53 = vmin.f32 %v688_v16, 32.0  ;;  %v472_v36 = vsub.f32 %v427_v35, %v2167_v55  ;;  %v723_v12 = vmin.f32 %v691_v40, 32.0  ;;  %v502_v22 = vand.u32 2147483647, %v470_v24 }
  0xfb   : > { %3123 = vst [vmem:[#allocation30_spill] sm:$0xff] %v2236_v39  ;;  %v690_v58 = vmax.f32 %v658_v63, 0.0  ;;  %v661_v18 = vfloor.f32 %v629_v44  ;;  %v501_v19 = vand.u32 2147483647, %v469_v49  ;;  %v471_v63 = vsub.f32 %v422_v47, %v2167_v55 }
  0xfc   : > { %v2242_v0 = vtrunc.f32 %v720_v53  ;;  %v504_v6 = vand.u32 2147483647, %v472_v36  ;;  %v2244_v30 = vtrunc.f32 %v723_v12  ;;  %v534_v16 = vmax.f32 %v502_v22, 1.0 }
  0xfd   : > { %v722_v20 = vmin.f32 %v690_v58, 32.0  ;;  %v693_v50 = vmax.f32 %v661_v18, 0.0  ;;  %v533_v42 = vmax.f32 %v501_v19, 1.0  ;;  %v503_v24 = vand.u32 2147483647, %v471_v63 }
  0xfe   : > { %3124 = vst [vmem:[#allocation31_spill] sm:$0xff] %v2242_v0  ;;  %3125 = vst [vmem:[#allocation32_spill] sm:$0xff] %v2244_v30  ;;  %v536_v62 = vmax.f32 %v504_v6, 1.0  ;;  %1607 = vlog2.f32 %v534_v16  ;;  %v1606_v49 = vpop.eup %1605  ;;  %v2307_v9 = vmov 0.0   ;;  %v2311_v4 = vmov 0.0  }
  0xff   : > { %v2248_v35 = vtrunc.f32 %v722_v20  ;;  %v725_v44 = vmin.f32 %v693_v50, 32.0  ;;  %1609 = vlog2.f32 %v533_v42  ;;  %v535_v22 = vmax.f32 %v503_v24, 1.0 }
 0x100   : > { %1611 = vlog2.f32 %v536_v62  ;;  %v590_v36 = vmul.f32 0.6931472, %v1606_v49  ;;  %v2313_v34 = vmov 0.0   ;;  %v2315_v38 = vmov 0.0  }
 0x101   : > { %3126 = vst [vmem:[#allocation33_spill] sm:$0xff] %v2248_v35  ;;  %v2252_v58 = vtrunc.f32 %v725_v44  ;;  %1613 = vlog2.f32 %v535_v22  ;;  %v2305_v22 = vmov 0.0   ;;  %v2317_v15 = vmov 0.0  }
 0x102   : > { %v628_v47 = vmul.f32 3.3222592, %v590_v36  ;;  %v2319_v33 = vmov 0.0   ;;  %v2321_v56 = vmov 0.0   ;;  %v2323_v60 = vmov 0.0  }
 0x103   : > { %3127 = vst [vmem:[#allocation34_spill] sm:$0xff] %v2252_v58  ;;  %v2325_v32 = vmov 0.0   ;;  %v2327_v37 = vmov 0.0   ;;  %v2333_v17 = vmov 0.0  }
 0x104   : > { %v660_v12 = vfloor.f32 %v628_v47 }
 0x106   : > { %v692_v20 = vmax.f32 %v660_v12, 0.0 }
 0x108   : > { %v1608_v18 = vpop.eup %1607  ;;  %v724_v16 = vmin.f32 %v692_v20, 32.0 }
 0x109   : > { %v1610_v19 = vpop.eup %1609  ;;  %v596_v6 = vmul.f32 0.6931472, %v1608_v18 }
 0x10a   : > { %v1612_v50 = vpop.eup %1611  ;;  %v594_v63 = vmul.f32 0.6931472, %v1610_v19  ;;  %v2255_v53 = vtrunc.f32 %v724_v16 }
 0x10b   : > { %v631_v40 = vmul.f32 3.3222592, %v596_v6  ;;  %v600_v42 = vmul.f32 0.6931472, %v1612_v50  ;;  %v1614_v44 = vpop.eup %1613 }
 0x10c   : > { %3128 = vst [vmem:[#allocation35_spill] sm:$0xff] %v2255_v53  ;;  %v630_v62 = vmul.f32 3.3222592, %v594_v63  ;;  %v598_v55 = vmul.f32 0.6931472, %v1614_v44 }
 0x10d   : > { %v663_v24 = vfloor.f32 %v631_v40  ;;  %v633_v59 = vmul.f32 3.3222592, %v600_v42  ;;  %v2301_v40 = vmov 0.0  }
 0x10e   : > { %v662_v49 = vfloor.f32 %v630_v62  ;;  %v632_v12 = vmul.f32 3.3222592, %v598_v55  ;;  %v2297_v55 = vmov 0.0  }
 0x10f   : > { %v695_v36 = vmax.f32 %v663_v24, 0.0  ;;  %v665_v47 = vfloor.f32 %v633_v59  ;;  %v2299_v24 = vmov 0.0   ;;  %v2303_v59 = vmov 0.0  }
 0x110   : > { %v694_v28 = vmax.f32 %v662_v49, 0.0  ;;  %v664_v19 = vfloor.f32 %v632_v12  ;;  %v2275_v49 = vmov 0.0   ;;  %v2281_v12 = vmov 0.0  }
 0x111   : > { %v727_v18 = vmin.f32 %v695_v36, 32.0  ;;  %v697_v20 = vmax.f32 %v665_v47, 0.0  ;;  %v2277_v36 = vmov 0.0   ;;  %v2279_v47 = vmov 0.0  }
 0x112   : > { %v726_v6 = vmin.f32 %v694_v28, 32.0  ;;  %v696_v43 = vmax.f32 %v664_v19, 0.0  ;;  %v2273_v28 = vmov 0.0   ;;  %v2289_v19 = vmov 0.0  }
 0x113   : > { %v2258_v50 = vtrunc.f32 %v727_v18  ;;  %v729_v16 = vmin.f32 %v697_v20, 32.0  ;;  %v2285_v18 = vmov 0.0   ;;  %v2287_v20 = vmov 0.0  }
 0x114   : > { %v2260_v63 = vtrunc.f32 %v726_v6  ;;  %v728_v44 = vmin.f32 %v696_v43, 32.0  ;;  %v2283_v43 = vmov 0.0   ;;  %v2291_v6 = vmov 0.0  }
 0x115   : > { %3129 = vst [vmem:[#allocation36_spill] sm:$0xff] %v2258_v50  ;;  %v2263_v42 = vtrunc.f32 %v729_v16  ;;  %v2293_v16 = vmov 0.0  }
 0x116   : > { %3130 = vst [vmem:[#allocation37_spill] sm:$0xff] %v2260_v63  ;;  %v2267_v62 = vtrunc.f32 %v728_v44  ;;  %v2295_v44 = vmov 0.0  }
 0x117   : > { %3131 = vst [vmem:[#allocation38_spill] sm:$0xff] %v2263_v42 }
 0x118   : > { %3132 = vst [vmem:[#allocation39_spill] sm:$0xff] %v2267_v62 }
 0x119 LB: >> { %3133 = vst [vmem:[#allocation40_spill] sm:$0xff] %v1832_v28  ;;  %3134 = vst [vmem:[#allocation41_spill] sm:$0xff] %v1836_v49  ;;  %s833_s28 = sld [smem:[#allocation2 + %s1960_s27]]  ;;  %v800_v28 = vstv %s1960_s27  ;;  %v3142_v52 = vld [vmem:[#allocation9_spill] sm:$0xff]  ;;  %v3146_v8 = vld [vmem:[#allocation11_spill] sm:$0xff]  ;;  %s767_s29 = sadd.s32 1, %s1960_s27   ;;  %s1960_s27 = sphi %s2337_s27, %s3367_s27   ;;  %v1956_v61 = vphi %v2335_v61, %v3366_v61   ;;  %v1952_v17 = vphi %v2333_v17, %v3365_v17   ;;  %v1948_v57 = vphi %v2331_v57, %v3364_v57   ;;  %v1944_v13 = vphi %v2329_v13, %v3363_v13   ;;  %v1940_v37 = vphi %v2327_v37, %v3362_v37   ;;  %v1936_v32 = vphi %v2325_v32, %v3361_v32   ;;  %v1932_v60 = vphi %v2323_v60, %v3360_v60   ;;  %v1928_v56 = vphi %v2321_v56, %v3359_v56   ;;  %v1924_v33 = vphi %v2319_v33, %v3358_v33   ;;  %v1920_v15 = vphi %v2317_v15, %v3357_v15   ;;  %v1916_v38 = vphi %v2315_v38, %v3356_v38   ;;  %v1912_v34 = vphi %v2313_v34, %v3355_v34   ;;  %v1908_v4 = vphi %v2311_v4, %v3354_v4   ;;  %v1904_v23 = vphi %v2309_v23, %v3353_v23   ;;  %v1900_v9 = vphi %v2307_v9, %v3352_v9   ;;  %v1896_v22 = vphi %v2305_v22, %v3351_v22   ;;  %v1892_v59 = vphi %v2303_v59, %v3350_v59   ;;  %v1888_v40 = vphi %v2301_v40, %v3349_v40   ;;  %v1884_v24 = vphi %v2299_v24, %v3348_v24   ;;  %v1880_v55 = vphi %v2297_v55, %v3347_v55   ;;  %v1876_v44 = vphi %v2295_v44, %v3346_v44   ;;  %v1872_v16 = vphi %v2293_v16, %v3345_v16   ;;  %v1868_v6 = vphi %v2291_v6, %v3344_v6   ;;  %v1864_v19 = vphi %v2289_v19, %v3343_v19   ;;  %v1860_v20 = vphi %v2287_v20, %v3342_v20   ;;  %v1856_v18 = vphi %v2285_v18, %v3341_v18   ;;  %v1852_v43 = vphi %v2283_v43, %v3340_v43   ;;  %v1848_v12 = vphi %v2281_v12, %v3339_v12   ;;  %v1844_v47 = vphi %v2279_v47, %v3338_v47   ;;  %v1840_v36 = vphi %v2277_v36, %v3337_v36   ;;  %v1836_v49 = vphi %v2275_v49, %v3335_v49   ;;  %v1832_v28 = vphi %v2273_v28, %v3334_v28  }
 0x11a   : >> { %3135 = vst [vmem:[#allocation42_spill] sm:$0xff] %v1840_v36  ;;  %3136 = vst [vmem:[#allocation43_spill] sm:$0xff] %v1844_v47  ;;  %v3143_v36 = vcvt.f32.s32 %v3142_v52  ;;  %v3150_v46 = vld [vmem:[#allocation8_spill] sm:$0xff]  ;;  %v3154_v1 = vld [vmem:[#allocation10_spill] sm:$0xff]  ;;  %p2788_p9 = scmp.ge.s32.totalorder %s767_s29, 33   ;;  %s3367_s27 = smov %s767_s29 }
 0x11b   : >> { %3137 = vst [vmem:[#allocation44_spill] sm:$0xff] %v1848_v12  ;;  %3138 = vst [vmem:[#allocation45_spill] sm:$0xff] %v1852_v43  ;;  %v3147_v12 = vcvt.f32.s32 %v3146_v8  ;;  %v3158_v27 = vld [vmem:[#allocation13_spill] sm:$0xff]  ;;  %v3162_v21 = vld [vmem:[#allocation12_spill] sm:$0xff]  ;;  %s1167_s5 = sshll.u32 (%p2788_p9), %s2013_s19, 12  ;;  %s962_s6 = sshll.u32 (%p2788_p9), %s2271_s23, 4  ;;  %s2995_s6 = int_to_ptr.vmem [resolvable:$true] %s962_s6 }
 0x11c   : >> { %3139 = vst [vmem:[#allocation46_spill] sm:$0xff] %v1856_v18  ;;  %3140 = vst [vmem:[#allocation47_spill] sm:$0xff] %v1860_v20  ;;  %vm2418_vm0 = vcmp.eq.s32.totalorder %v3143_v36, %v800_v28  ;;  %v3151_v18 = vcvt.f32.s32 %v3150_v46  ;;  %v3159_v36 = vcvt.f32.s32 %v3158_v27  ;;  %v3166_v48 = vld [vmem:[#allocation15_spill] sm:$0xff]  ;;  %v3170_v41 = vld [vmem:[#allocation14_spill] sm:$0xff]  ;;  %s2993_s10 = scalar_lea.hbm (%p2788_p9), %s3060_s4, %s1167_s5  ;;  %s3015_s11 = scalar_lea.sflag (%p2788_p9), [#allocation3], %s219_s12 }
 0x11d   : >> { %3141 = vst [vmem:[#allocation48_spill] sm:$0xff] %v1864_v19  ;;  %vm2424_vm1 = vcmp.eq.s32.totalorder %v3147_v12, %v800_v28  ;;  %v3155_v19 = vcvt.f32.s32 %v3154_v1  ;;  %v3163_v12 = vcvt.f32.s32 %v3162_v21  ;;  %v3174_v7 = vld [vmem:[#allocation17_spill] sm:$0xff]  ;;  %v3178_v2 = vld [vmem:[#allocation16_spill] sm:$0xff]  ;;  %v3182_v29 = vld [vmem:[#allocation19_spill] sm:$0xff]  ;;  %s1630_s13 = scalar_lea.vmem (%p2788_p9), %s2995_s6, 4096  ;;  %s1964_s14 = smov (%p2788_p9), [#allocation5]  }
 0x11e   : >> { %vm2430_vm2 = vcmp.eq.s32.totalorder %v3151_v18, %v800_v28  ;;  %vm2442_vm4 = vcmp.eq.s32.totalorder %v3159_v36, %v800_v28  ;;  %v3167_v18 = vcvt.f32.s32 %v3166_v48  ;;  %v3175_v36 = vcvt.f32.s32 %v3174_v7  ;;  %v3186_v5 = vld [vmem:[#allocation18_spill] sm:$0xff]  ;;  %v3190_v54 = vld [vmem:[#allocation21_spill] sm:$0xff]  ;;  %v3194_v14 = vld [vmem:[#allocation20_spill] sm:$0xff]  ;;  %p1631_p10 = scmp.ne.s32.totalorder (%p2788_p9), %s2995_s6, %s1630_s13  ;;  %s1634_s20 = sshll.u32 (%p2788_p9), %s1964_s14, 4  ;;  %s1635_s20 = int_to_ptr.vmem [resolvable:$false] %s1634_s20 }
 0x11f   : >> { %v2414_v49 = vstv %s833_s28  ;;  %vm2436_vm3 = vcmp.eq.s32.totalorder %v3155_v19, %v800_v28  ;;  %vm2448_vm5 = vcmp.eq.s32.totalorder %v3163_v12, %v800_v28  ;;  %v3171_v19 = vcvt.f32.s32 %v3170_v41  ;;  %v3198_v25 = vld [vmem:[#allocation23_spill] sm:$0xff]  ;;  %v3202_v26 = vld [vmem:[#allocation22_spill] sm:$0xff]  ;;  %v3206_v10 = vld [vmem:[#allocation25_spill] sm:$0xff]  ;;  %s1636_s22 = scalar_lea.vmem (%p2788_p9), %s1635_s20, 8192  ;;  %p1637_p0 = scmp.lt.s32.totalorder (%p2788_p9), %s2995_s6, %s1635_s20 }
 0x120   : >> { %vm2454_vm6 = vcmp.eq.s32.totalorder %v3167_v18, %v800_v28  ;;  %vm2466_vm8 = vcmp.eq.s32.totalorder %v3175_v36, %v800_v28  ;;  %v3179_v12 = vcvt.f32.s32 %v3178_v2  ;;  %v3183_v18 = vcvt.f32.s32 %v3182_v29  ;;  %v3210_v45 = vld [vmem:[#allocation24_spill] sm:$0xff]  ;;  %v3214_v51 = vld [vmem:[#allocation27_spill] sm:$0xff]  ;;  %v3218_v31 = vld [vmem:[#allocation26_spill] sm:$0xff]  ;;  %p1632_p12 = pnand (%p2788_p9), %p1631_p10, %p2030_p5  ;;  %p1638_p1 = scmp.lt.s32.totalorder (%p2788_p9), %s1636_s22, %s1630_s13 }
 0x121   : >> { %vm2460_vm7 = vcmp.eq.s32.totalorder %v3171_v19, %v800_v28  ;;  %v3187_v19 = vcvt.f32.s32 %v3186_v5  ;;  %v3191_v36 = vcvt.f32.s32 %v3190_v54  ;;  %v3192_v2 = vmov 0  ;;  %v3222_v11 = vld [vmem:[#allocation29_spill] sm:$0xff]  ;;  %v3226_v3 = vld [vmem:[#allocation28_spill] sm:$0xff]  ;;  %v3230_v0 = vld [vmem:[#allocation31_spill] sm:$0xff] }
 0x122   : >> { %vm2472_vm9 = vcmp.eq.s32.totalorder %v3179_v12, %v800_v28  ;;  %vm2478_vm10 = vcmp.eq.s32.totalorder %v3183_v18, %v800_v28  ;;  %v3195_v12 = vcvt.f32.s32 %v3194_v14  ;;  %v3196_v29 = vmov 0  ;;  %v3234_v39 = vld [vmem:[#allocation30_spill] sm:$0xff]  ;;  %v3238_v35 = vld [vmem:[#allocation33_spill] sm:$0xff]  ;;  %v3242_v30 = vld [vmem:[#allocation32_spill] sm:$0xff]  ;;  %p1633_p13 = pneg (%p2788_p9), %p1632_p12  ;;  %p1639_p2 = por (%p2788_p9), %p1638_p1, %p1637_p0 }
 0x123   : >> { %vm2484_vm11 = vcmp.eq.s32.totalorder %v3187_v19, %v800_v28  ;;  %vm2490_vm12 = vcmp.eq.s32.totalorder %v3191_v36, %v800_v28  ;;  %v3199_v18 = vcvt.f32.s32 %v3198_v25  ;;  %v3200_v5 = vmov 0  ;;  %v3246_v53 = vld [vmem:[#allocation35_spill] sm:$0xff]  ;;  %v3250_v58 = vld [vmem:[#allocation34_spill] sm:$0xff]  ;;  %v3254_v63 = vld [vmem:[#allocation37_spill] sm:$0xff] }
 0x124   : >> { %v3193_v2 = vsel %vm2490_vm12, 4294967295, %v3192_v2  ;;  %vm2496_vm13 = vcmp.eq.s32.totalorder %v3195_v12, %v800_v28  ;;  %v3203_v19 = vcvt.f32.s32 %v3202_v26  ;;  %v3204_v54 = vmov 0  ;;  %v3258_v50 = vld [vmem:[#allocation36_spill] sm:$0xff]  ;;  %v3262_v62 = vld [vmem:[#allocation39_spill] sm:$0xff]  ;;  %v3267_v42 = vld [vmem:[#allocation38_spill] sm:$0xff]  ;;  %p1640_p3 = pnand (%p2788_p9), %p1639_p2, %p1633_p13 }
 0x125   : >> { %v3197_v29 = vsel %vm2496_vm13, 4294967295, %v3196_v29  ;;  %vm2502_vm14 = vcmp.eq.s32.totalorder %v3199_v18, %v800_v28  ;;  %v3207_v36 = vcvt.f32.s32 %v3206_v10  ;;  %v3208_v14 = vmov 0 }
 0x126   : >> { %v3201_v5 = vsel %vm2502_vm14, 4294967295, %v3200_v5  ;;  %vm2508_vm15 = vcmp.eq.s32.totalorder %v3203_v19, %v800_v28  ;;  %v3211_v12 = vcvt.f32.s32 %v3210_v45  ;;  %v3212_v25 = vmov 0 }
 0x127   : >> { %v3205_v54 = vsel %vm2508_vm15, 4294967295, %v3204_v54  ;;  %vm2514_vm12 = vcmp.eq.s32.totalorder %v3207_v36, %v800_v28  ;;  %v3215_v18 = vcvt.f32.s32 %v3214_v51  ;;  %v3216_v26 = vmov 0 }
 0x128   : >> { %v3209_v14 = vsel %vm2514_vm12, 4294967295, %v3208_v14  ;;  %vm2520_vm13 = vcmp.eq.s32.totalorder %v3211_v12, %v800_v28  ;;  %v3219_v19 = vcvt.f32.s32 %v3218_v31  ;;  %v3220_v10 = vmov 0 }
 0x129   : >> { %v3213_v25 = vsel %vm2520_vm13, 4294967295, %v3212_v25  ;;  %vm2526_vm14 = vcmp.eq.s32.totalorder %v3215_v18, %v800_v28  ;;  %v3223_v36 = vcvt.f32.s32 %v3222_v11  ;;  %v3224_v45 = vmov 0 }
 0x12a   : >> { %v3217_v26 = vsel %vm2526_vm14, 4294967295, %v3216_v26  ;;  %vm2532_vm15 = vcmp.eq.s32.totalorder %v3219_v19, %v800_v28  ;;  %v3227_v12 = vcvt.f32.s32 %v3226_v3  ;;  %v3228_v51 = vmov 0 }
 0x12b   : >> { %v3221_v10 = vsel %vm2532_vm15, 4294967295, %v3220_v10  ;;  %vm2538_vm12 = vcmp.eq.s32.totalorder %v3223_v36, %v800_v28  ;;  %v3231_v18 = vcvt.f32.s32 %v3230_v0  ;;  %v3232_v31 = vmov 0 }
 0x12c   : >> { %v3225_v45 = vsel %vm2538_vm12, 4294967295, %v3224_v45  ;;  %vm2544_vm13 = vcmp.eq.s32.totalorder %v3227_v12, %v800_v28  ;;  %v3235_v19 = vcvt.f32.s32 %v3234_v39  ;;  %v3236_v11 = vmov 0 }
 0x12d   : >> { %v3229_v51 = vsel %vm2544_vm13, 4294967295, %v3228_v51  ;;  %vm2550_vm14 = vcmp.eq.s32.totalorder %v3231_v18, %v800_v28  ;;  %v3239_v36 = vcvt.f32.s32 %v3238_v35  ;;  %v3240_v3 = vmov 0 }
 0x12e   : >> { %v3233_v31 = vsel %vm2550_vm14, 4294967295, %v3232_v31  ;;  %vm2556_vm15 = vcmp.eq.s32.totalorder %v3235_v19, %v800_v28  ;;  %v3243_v12 = vcvt.f32.s32 %v3242_v30  ;;  %v3244_v0 = vmov 0 }
 0x12f   : >> { %v3237_v11 = vsel %vm2556_vm15, 4294967295, %v3236_v11  ;;  %vm2562_vm12 = vcmp.eq.s32.totalorder %v3239_v36, %v800_v28  ;;  %v3247_v18 = vcvt.f32.s32 %v3246_v53  ;;  %v3248_v39 = vmov 0  ;;  %v868_v53 = vld [vmem:[%s3059_s3 + $0x8] sm:$0xff] (%p2788_p9) }
 0x130   : >> { %v3241_v3 = vsel %vm2562_vm12, 4294967295, %v3240_v3  ;;  %vm2568_vm13 = vcmp.eq.s32.totalorder %v3243_v12, %v800_v28  ;;  %v3251_v19 = vcvt.f32.s32 %v3250_v58  ;;  %v3252_v35 = vmov 0 }
 0x131   : >> { %v3245_v0 = vsel %vm2568_vm13, 4294967295, %v3244_v0  ;;  %vm2574_vm14 = vcmp.eq.s32.totalorder %v3247_v18, %v800_v28  ;;  %v3255_v36 = vcvt.f32.s32 %v3254_v63  ;;  %v3259_v12 = vcvt.f32.s32 %v3258_v50  ;;  %v869_v63 = vld [vmem:[%s3059_s3 + $0x10] sm:$0xff] (%p2788_p9) }
 0x132   : >> { %v3249_v39 = vsel %vm2574_vm14, 4294967295, %v3248_v39  ;;  %vm2580_vm15 = vcmp.eq.s32.totalorder %v3251_v19, %v800_v28  ;;  %v3263_v18 = vcvt.f32.s32 %v3262_v62  ;;  %v3264_v58 = vmov 0 }
 0x133   : >> { %v3253_v35 = vsel %vm2580_vm15, 4294967295, %v3252_v35  ;;  %vm2586_vm12 = vcmp.eq.s32.totalorder %v3255_v36, %v800_v28  ;;  %vm2592_vm13 = vcmp.eq.s32.totalorder %v3259_v12, %v800_v28  ;;  %v3268_v19 = vcvt.f32.s32 %v3267_v42 }
 0x134   : >> { %vm2598_vm14 = vcmp.eq.s32.totalorder %v3263_v18, %v800_v28  ;;  %v2611_v61 = vsel %vm2418_vm0, %v2414_v49, %v1956_v61   ;;  %v2616_v17 = vsel %vm2424_vm1, %v2414_v49, %v1952_v17   ;;  %v2621_v57 = vsel %vm2430_vm2, %v2414_v49, %v1948_v57  }
 0x135   : >> { %v3265_v58 = vsel %vm2598_vm14, 4294967295, %v3264_v58  ;;  %vm2604_vm15 = vcmp.eq.s32.totalorder %v3268_v19, %v800_v28  ;;  %3271 = vst [vmem:[#allocation50_spill] sm:$0xff] %v2611_v61  ;;  %3272 = vst [vmem:[#allocation51_spill] sm:$0xff] %v2616_v17  ;;  %v2626_v13 = vsel %vm2436_vm3, %v2414_v49, %v1944_v13   ;;  %v2631_v37 = vsel %vm2442_vm4, %v2414_v49, %v1940_v37   ;;  %v3307_v61 = vld [vmem:[#allocation47_spill] sm:$0xff]  ;;  %v3313_v17 = vld [vmem:[#allocation45_spill] sm:$0xff] }
 0x136   : >> { %3266 = vst [vmem:[#allocation49_spill] sm:$0xff] %v3265_v58  ;;  %3273 = vst [vmem:[#allocation52_spill] sm:$0xff] %v2621_v57  ;;  %v3274_v42 = vmov %v2626_v13  ;;  %v3275_v50 = vmov %v2631_v37  ;;  %v2636_v32 = vsel %vm2448_vm5, %v2414_v49, %v1936_v32   ;;  %v2641_v60 = vsel %vm2454_vm6, %v2414_v49, %v1932_v60   ;;  %v3304_v57 = vld [vmem:[#allocation48_spill] sm:$0xff]  ;;  %v3310_v13 = vld [vmem:[#allocation46_spill] sm:$0xff] }
 0x137   : >> { %v3276_v62 = vmov %v2636_v32  ;;  %v3277_v58 = vmov %v2641_v60  ;;  %v2646_v56 = vsel %vm2460_vm7, %v2414_v49, %v1928_v56   ;;  %v2651_v33 = vsel %vm2466_vm8, %v2414_v49, %v1924_v33   ;;  %v3316_v32 = vld [vmem:[#allocation44_spill] sm:$0xff]  ;;  %v3319_v37 = vld [vmem:[#allocation43_spill] sm:$0xff]  ;;  %v3325_v60 = vld [vmem:[#allocation41_spill] sm:$0xff] }
 0x138   : >> { %v3278_v52 = vmov %v2646_v56  ;;  %v3279_v8 = vmov %v2651_v33  ;;  %v2656_v15 = vsel %vm2472_vm9, %v2414_v49, %v1920_v15   ;;  %v2661_v38 = vsel %vm2478_vm10, %v2414_v49, %v1916_v38   ;;  %v3322_v56 = vld [vmem:[#allocation42_spill] sm:$0xff] }
 0x139   : >> { %v3280_v46 = vmov %v2656_v15  ;;  %v3281_v1 = vmov %v2661_v38  ;;  %v2666_v34 = vsel %vm2484_vm11, %v2414_v49, %v1912_v34   ;;  %vm3283_vm0 = vnez %v3193_v2 }
 0x13a   : >> { %v3282_v27 = vmov %v2666_v34  ;;  %v2671_v4 = vsel %vm3283_vm0, %v2414_v49, %v1908_v4   ;;  %vm3285_vm1 = vnez %v3197_v29  ;;  %vm3287_vm2 = vnez %v3201_v5  ;;  %v3329_v34 = vld [vmem:[#allocation40_spill] sm:$0xff] }
 0x13b   : >> { %v3284_v21 = vmov %v2671_v4  ;;  %v2677_v23 = vsel %vm3285_vm1, %v2414_v49, %v1904_v23   ;;  %v2683_v9 = vsel %vm3287_vm2, %v2414_v49, %v1900_v9   ;;  %vm3289_vm3 = vnez %v3205_v54 }
 0x13c   : >> { %v3286_v48 = vmov %v2677_v23  ;;  %v3288_v41 = vmov %v2683_v9  ;;  %v2689_v22 = vsel %vm3289_vm3, %v2414_v49, %v1896_v22   ;;  %vm3291_vm4 = vnez %v3209_v14 }
 0x13d   : >> { %v3290_v2 = vmov %v2689_v22  ;;  %v851_v7 = vsel %vm3291_vm4, %v2414_v49, %v1892_v59   ;;  %vm3292_vm5 = vnez %v3213_v25  ;;  %vm3294_vm6 = vnez %v3217_v26 }
 0x13e   : >> { %v2699_v40 = vsel %vm3292_vm5, %v2414_v49, %v1888_v40   ;;  %v2705_v24 = vsel %vm3294_vm6, %v2414_v49, %v1884_v24   ;;  %vm3296_vm7 = vnez %v3221_v10  ;;  %vm3298_vm8 = vnez %v3225_v45 }
 0x13f   : >> { %v3293_v29 = vmov %v2699_v40  ;;  %v3295_v5 = vmov %v2705_v24  ;;  %v2711_v55 = vsel %vm3296_vm7, %v2414_v49, %v1880_v55   ;;  %v2717_v44 = vsel %vm3298_vm8, %v2414_v49, %v1876_v44  }
 0x140   : >> { %v3297_v54 = vmov %v2711_v55  ;;  %v3299_v14 = vmov %v2717_v44  ;;  %vm3300_vm9 = vnez %v3229_v51  ;;  %vm3302_vm10 = vnez %v3233_v31 }
 0x141   : >> { %v2723_v16 = vsel %vm3300_vm9, %v2414_v49, %v1872_v16   ;;  %v2729_v6 = vsel %vm3302_vm10, %v2414_v49, %v1868_v6   ;;  %vm3305_vm11 = vnez %v3237_v11  ;;  %vm3308_vm0 = vnez %v3241_v3 }
 0x142   : >> { %v3301_v26 = vmov %v2723_v16  ;;  %v3303_v25 = vmov %v2729_v6  ;;  %v2735_v19 = vsel %vm3305_vm11, %v2414_v49, %v3304_v57   ;;  %v2741_v20 = vsel %vm3308_vm0, %v2414_v49, %v3307_v61   ;;  %v3364_v57 = vld [vmem:[#allocation52_spill] sm:$0xff]  ;;  %v3366_v61 = vld [vmem:[#allocation50_spill] sm:$0xff] }
 0x143   : >> { %v3306_v45 = vmov %v2735_v19  ;;  %v3309_v10 = vmov %v2741_v20  ;;  %vm3311_vm1 = vnez %v3245_v0  ;;  %vm3314_vm2 = vnez %v3249_v39 }
 0x144   : >> { %v2747_v18 = vsel %vm3311_vm1, %v2414_v49, %v3310_v13   ;;  %v2753_v43 = vsel %vm3314_vm2, %v2414_v49, %v3313_v17   ;;  %vm3317_vm3 = vnez %v3253_v35  ;;  %v2765_v47 = vsel %vm2586_vm12, %v2414_v49, %v3319_v37   ;;  %v3365_v17 = vld [vmem:[#allocation51_spill] sm:$0xff]  ;;  %v867_v35 = vld [vmem:[%s3059_s3] sm:$0xff] (%p2788_p9) }
 0x145   : >> { %v3312_v31 = vmov %v2747_v18  ;;  %v3315_v51 = vmov %v2753_v43  ;;  %v2759_v12 = vsel %vm3317_vm3, %v2414_v49, %v3316_v32   ;;  %3320 = vst [vmem:[#allocation53_spill] sm:$0xff] %v2765_v47  ;;  %v3321_v11 = vmov %v2765_v47 }
 0x146   : >> { %v3318_v3 = vmov %v2759_v12  ;;  %v2771_v36 = vsel %vm2592_vm13, %v2414_v49, %v3322_v56   ;;  %v2777_v33 = vsel %vm2598_vm14, %v2414_v49, %v3325_v60   ;;  %v2783_v28 = vsel %vm2604_vm15, %v2414_v49, %v3329_v34  }
 0x147   : >> { %3323 = vst [vmem:[#allocation54_spill] sm:$0xff] %v2771_v36  ;;  %3327 = vst [vmem:[#allocation55_spill] sm:$0xff] %v2777_v33  ;;  %v3328_v0 = vmov %v2777_v33  ;;  %v3333_v30 = vmov %v2783_v28  ;;  %v3336_v39 = vmov %v2771_v36  ;;  %v3338_v47 = vmov %v3321_v11  ;;  %v3370_v11 = vld [vmem:[#allocation52_spill] sm:$0xff] (%p2788_p9) }
 0x148   : >> { %3330 = vst [vmem:[#allocation56_spill] sm:$0xff] %v2783_v28  ;;  %v3334_v28 = vmov %v3333_v30  ;;  %v3335_v49 = vmov %v3328_v0  ;;  %v3337_v36 = vmov %v3336_v39  ;;  %v3339_v12 = vmov %v3318_v3  ;;  %766 = sbr.rel (!%p2788_p9) target bundleno = 281 (0x119), region = 86  ;;  %v3368_v30 = vld [vmem:[#allocation50_spill] sm:$0xff] (%p2788_p9)  ;;  %v3369_v0 = vld [vmem:[#allocation51_spill] sm:$0xff] (%p2788_p9) }
 0x149   : >> { %v3340_v43 = vmov %v3315_v51  ;;  %v3341_v18 = vmov %v3312_v31  ;;  %v3342_v20 = vmov %v3309_v10  ;;  %v3343_v19 = vmov %v3306_v45  ;;  %v874_v28 = vld [vmem:[%s3059_s3 + $0x38] sm:$0xff] (%p2788_p9)  ;;  %v879_v12 = vld [vmem:[%s3059_s3 + $0x60] sm:$0xff] (%p2788_p9) }
 0x14a   : >> { %v3344_v6 = vmov %v3303_v25  ;;  %v3345_v16 = vmov %v3301_v26  ;;  %v3346_v44 = vmov %v3299_v14  ;;  %v3347_v55 = vmov %v3297_v54  ;;  %v876_v43 = vld [vmem:[%s3059_s3 + $0x48] sm:$0xff] (%p2788_p9)  ;;  %v877_v20 = vld [vmem:[%s3059_s3 + $0x50] sm:$0xff] (%p2788_p9) }
 0x14b   : >> { %v3348_v24 = vmov %v3295_v5  ;;  %v3349_v40 = vmov %v3293_v29  ;;  %v3350_v59 = vmov %v851_v7  ;;  %v3351_v22 = vmov %v3290_v2  ;;  %v878_v6 = vld [vmem:[%s3059_s3 + $0x58] sm:$0xff] (%p2788_p9)  ;;  %v880_v18 = vld [vmem:[%s3059_s3 + $0x68] sm:$0xff] (%p2788_p9)  ;;  %v881_v19 = vld [vmem:[%s3059_s3 + $0x70] sm:$0xff] (%p2788_p9) }
 0x14c   : >> { %v3352_v9 = vmov %v3288_v41  ;;  %v3353_v23 = vmov %v3286_v48  ;;  %v3354_v4 = vmov %v3284_v21  ;;  %v3355_v34 = vmov %v3282_v27  ;;  %v873_v24 = vld [vmem:[%s3059_s3 + $0x30] sm:$0xff] (%p2788_p9) }
 0x14d   : >> { %v3356_v38 = vmov %v3281_v1  ;;  %v3357_v15 = vmov %v3280_v46  ;;  %v3358_v33 = vmov %v3279_v8  ;;  %v3359_v56 = vmov %v3278_v52  ;;  %v870_v23 = vld [vmem:[%s3059_s3 + $0x18] sm:$0xff] (%p2788_p9)  ;;  %v871_v4 = vld [vmem:[%s3059_s3 + $0x20] sm:$0xff] (%p2788_p9)  ;;  %v872_v9 = vld [vmem:[%s3059_s3 + $0x28] sm:$0xff] (%p2788_p9) }
 0x14e   : >> { %v3360_v60 = vmov %v3277_v58  ;;  %v3361_v32 = vmov %v3276_v62  ;;  %v3362_v37 = vmov %v3275_v50  ;;  %v3363_v13 = vmov %v3274_v42  ;;  %v3372_v57 = vld [vmem:[#allocation54_spill] sm:$0xff] (%p2788_p9) }
 0x14f   : > { %v883_v61 = vadd.f32 %v867_v35, %v3368_v30  ;;  %v884_v39 = vadd.f32 %v868_v53, %v3369_v0  ;;  %v885_v38 = vadd.f32 %v869_v63, %v3370_v11  ;;  %v899_v22 = vadd.f32 %v867_v35, %v851_v7 }
 0x150   : > { %v886_v40 = vadd.f32 %v870_v23, %v3274_v42  ;;  %v887_v59 = vadd.f32 %v871_v4, %v3275_v50  ;;  %v888_v55 = vadd.f32 %v872_v9, %v3276_v62  ;;  %v875_v42 = vld [vmem:[%s3059_s3 + $0x40] sm:$0xff]  ;;  %v900_v49 = vadd.f32 %v868_v53, %v3293_v29 }
 0x151   : > { %915 = vst [vmem:[%s2271_s23] sm:$0xff] %v883_v61  ;;  %916 = vst [vmem:[%s2271_s23 + $0x8] sm:$0xff] %v884_v39  ;;  %v889_v50 = vadd.f32 %v873_v24, %v3277_v58  ;;  %v890_v62 = vadd.f32 %v874_v28, %v3278_v52  ;;  %v891_v47 = vadd.f32 %v875_v42, %v3279_v8 }
 0x152   : > { %917 = vst [vmem:[%s2271_s23 + $0x10] sm:$0xff] %v885_v38  ;;  %931 = vst [vmem:[%s2271_s23 + $0x80] sm:$0xff] %v899_v22  ;;  %v901_v58 = vadd.f32 %v869_v63, %v3295_v5  ;;  %v892_v16 = vadd.f32 %v876_v43, %v3280_v46  ;;  %v893_v44 = vadd.f32 %v877_v20, %v3281_v1 }
 0x153   : > { %918 = vst [vmem:[%s2271_s23 + $0x18] sm:$0xff] %v886_v40  ;;  %919 = vst [vmem:[%s2271_s23 + $0x20] sm:$0xff] %v887_v59  ;;  %v894_v36 = vadd.f32 %v878_v6, %v3282_v27  ;;  %v902_v52 = vadd.f32 %v870_v23, %v3297_v54  ;;  %v895_v8 = vadd.f32 %v879_v12, %v3284_v21  ;;  %v882_v27 = vld [vmem:[%s3059_s3 + $0x78] sm:$0xff] }
 0x154   : > { %920 = vst [vmem:[%s2271_s23 + $0x28] sm:$0xff] %v888_v55  ;;  %932 = vst [vmem:[%s2271_s23 + $0x88] sm:$0xff] %v900_v49  ;;  %v896_v46 = vadd.f32 %v880_v18, %v3286_v48  ;;  %v897_v1 = vadd.f32 %v881_v19, %v3288_v41  ;;  %v903_v7 = vadd.f32 %v871_v4, %v3299_v14 }
 0x155   : > { %921 = vst [vmem:[%s2271_s23 + $0x30] sm:$0xff] %v889_v50  ;;  %922 = vst [vmem:[%s2271_s23 + $0x38] sm:$0xff] %v890_v62  ;;  %v898_v29 = vadd.f32 %v882_v27, %v3290_v2  ;;  %v904_v21 = vadd.f32 %v872_v9, %v3301_v26  ;;  %v905_v48 = vadd.f32 %v873_v24, %v3303_v25  ;;  %v3371_v26 = vld [vmem:[#allocation53_spill] sm:$0xff] }
 0x156   : > { %923 = vst [vmem:[%s2271_s23 + $0x40] sm:$0xff] %v891_v47  ;;  %933 = vst [vmem:[%s2271_s23 + $0x90] sm:$0xff] %v901_v58  ;;  %v906_v41 = vadd.f32 %v874_v28, %v3306_v45  ;;  %v907_v5 = vadd.f32 %v875_v42, %v3309_v10  ;;  %v908_v2 = vadd.f32 %v876_v43, %v3312_v31  ;;  %v3373_v10 = vld [vmem:[#allocation55_spill] sm:$0xff]  ;;  %v3374_v31 = vld [vmem:[#allocation56_spill] sm:$0xff] }
 0x157   : > { %924 = vst [vmem:[%s2271_s23 + $0x48] sm:$0xff] %v892_v16  ;;  %925 = vst [vmem:[%s2271_s23 + $0x50] sm:$0xff] %v893_v44  ;;  %v909_v54 = vadd.f32 %v877_v20, %v3315_v51  ;;  %v910_v14 = vadd.f32 %v878_v6, %v3318_v3  ;;  %v911_v25 = vadd.f32 %v879_v12, %v3371_v26 }
 0x158   : > { %926 = vst [vmem:[%s2271_s23 + $0x58] sm:$0xff] %v894_v36  ;;  %934 = vst [vmem:[%s2271_s23 + $0x98] sm:$0xff] %v902_v52  ;;  %v912_v45 = vadd.f32 %v880_v18, %v3372_v57  ;;  %v913_v13 = vadd.f32 %v881_v19, %v3373_v10  ;;  %v914_v17 = vadd.f32 %v882_v27, %v3374_v31 }
 0x159   : > { %927 = vst [vmem:[%s2271_s23 + $0x60] sm:$0xff] %v895_v8  ;;  %928 = vst [vmem:[%s2271_s23 + $0x68] sm:$0xff] %v896_v46 }
 0x15a   : > { %929 = vst [vmem:[%s2271_s23 + $0x70] sm:$0xff] %v897_v1  ;;  %935 = vst [vmem:[%s2271_s23 + $0xa0] sm:$0xff] %v903_v7 }
 0x15b   : > { %930 = vst [vmem:[%s2271_s23 + $0x78] sm:$0xff] %v898_v29  ;;  %936 = vst [vmem:[%s2271_s23 + $0xa8] sm:$0xff] %v904_v21 }
 0x15c   : > { %937 = vst [vmem:[%s2271_s23 + $0xb0] sm:$0xff] %v905_v48  ;;  %938 = vst [vmem:[%s2271_s23 + $0xb8] sm:$0xff] %v906_v41 }
 0x15d   : > { %939 = vst [vmem:[%s2271_s23 + $0xc0] sm:$0xff] %v907_v5  ;;  %940 = vst [vmem:[%s2271_s23 + $0xc8] sm:$0xff] %v908_v2 }
 0x15e   : > { %941 = vst [vmem:[%s2271_s23 + $0xd0] sm:$0xff] %v909_v54  ;;  %942 = vst [vmem:[%s2271_s23 + $0xd8] sm:$0xff] %v910_v14 }
 0x15f   : > { %943 = vst [vmem:[%s2271_s23 + $0xe0] sm:$0xff] %v911_v25  ;;  %944 = vst [vmem:[%s2271_s23 + $0xe8] sm:$0xff] %v912_v45 }
 0x160   : > { %945 = vst [vmem:[%s2271_s23 + $0xf0] sm:$0xff] %v913_v13  ;;  %946 = vst [vmem:[%s2271_s23 + $0xf8] sm:$0xff] %v914_v17 }
 0x161   : > { %1643 = shalt.err (!%p1640_p3)
}
 0x162   : > { %s1644_s12 = scalar_lea.hbm %s2993_s10, 4096  ;;  %s1648_s28 = scalar_lea.hbm %s3060_s4, 8192 }
 0x163   : > { %p1645_p4 = scmp.ne.s32.totalorder %s2993_s10, %s1644_s12  ;;  %p1649_p11 = scmp.lt.u32.totalorder %s2993_s10, %s3060_s4 }
 0x164   : > { %p1650_p9 = scmp.lt.u32.totalorder %s1648_s28, %s1644_s12  ;;  %p1652_p12 = scmp.lt.u32.totalorder %s1644_s12, %s2993_s10 }
 0x165   : > { %p1646_p7 = pnand %p1645_p4, %p2030_p5 }
 0x166   : > { %p1651_p10 = por %p1650_p9, %p1649_p11 }
 0x167   : > { %p1647_p8 = pneg %p1646_p7 }
 0x168   : > { %p1653_p13 = por %p1652_p12, %p1651_p10 }
 0x16a   : > { %p1654_p0 = pnand %p1653_p13, %p1647_p8 }
 0x16c   : > { %1657 = shalt.err (!%p1654_p0)
}
 0x16d   : > { %s1965_s5 = smov 128   ;;  %s1966_s7 = smov 8  }
 0x16e   : > { %1236 = dma.vmem_to_hbm [thread:$0]  (%p2030_p5), %s2995_s6, 4096, %s2993_s10, %s3015_s11, %s1965_s5, %s1965_s5, %s1966_s7  }
 0x16f PF: > { %p1248_p1 = scmp.ge.s32.totalorder %s1828_s18, 2  ;;  %s977_s8 = sand.u32 1, %s1816_s15  }
 0x170   : > { %s978_s19 = scalar_lea.sflag [#allocation3], %s977_s8 }
 0x171   : > { %p1243_p2 = pnand %p1248_p1, %p2034_p6 }
 0x173   : > { %1811 = dma.done.wait (!%p1243_p2), %s978_s19, 4096  }
 0x174   : > { %1813 = vsyncadd (!%p1243_p2), %s978_s19, 4294963200  ;;  %p15_p3 = scmp.ge.s32.totalorder %s2017_s21, 4   ;;  %s3375_s15 = smov %s1820_s16 }
 0x175   : > { %s3376_s16 = smov %s1824_s17  ;;  %s3377_s17 = smov %s2028_s24 }
 0x176   : > { %s3378_s18 = smov %s2017_s21  ;;  %17 = sbr.rel (!%p15_p3) target bundleno = 4 (0x4), region = 97 }
 0x17d   :  { %983 = vsyncpa [#allocation3], 1 }
 0x17e   :  { %985 = vsyncpa [#allocation3 + $0x1], 1 }
 0x17f   :  { %986 = vsyncpa [#allocation4], 1 }
 0x180   :  { %988 = vsyncpa [#allocation4 + $0x1], 1 }

</bundles_post_ra>
